<compile_context>
chip_gen: v7x
topology: tpu7x:2x2x1
jax: 0.10.0
libtpu: 0.0.40
codegen_flags: <defaults>
</compile_context>

<pallas_src>
import jax
import jax.numpy as jnp
from jax.experimental import pallas as pl
from jax.experimental.pallas import tpu as pltpu


def _constitution_kernel(x_ref, w1_ref, b1_ref, w2_ref, b2_ref,
                         sw_ref, wf_ref, bf_ref, o_ref):
    # x: [P, TB] -- principles on sublanes, batch on the 128-lane axis.
    x = x_ref[...]

    # attention MLP, transposed orientation (outputs stay lane-dense in B):
    #   h      = W1 @ x + b1    -> [H2, TB]
    #   logits = W2 @ h + b2    -> [P,  TB]
    h = jnp.dot(w1_ref[...], x, preferred_element_type=jnp.float32) + b1_ref[...]
    h = jnp.maximum(h, 0.0)
    logits = (jnp.dot(w2_ref[...], h, preferred_element_type=jnp.float32)
              + b2_ref[...])

    # softmax over the principle (sublane) axis; EUP approx reciprocal.
    m = jnp.max(logits, axis=0, keepdims=True)
    e = jnp.exp(logits - m)
    inv = pl.reciprocal(jnp.sum(e, axis=0, keepdims=True), approx=True)
    dyn = e * inv

    # combined = 0.7 * dynamic + 0.3 * static   (static: [P, 1], lane-broadcast)
    combined = 0.7 * dyn + 0.3 * sw_ref[...]
    weighted = x * combined                                    # [P, TB]

    # final Linear(P, 1) as VPU multiply + sublane reduce, lane-dense [1, TB] out.
    o_ref[...] = (jnp.sum(weighted * wf_ref[...], axis=0, keepdims=True)
                  + bf_ref[0, 0])


def constitution_aggregator(principle_scores, rule_weights, params, tile_b=128):
    """principle_scores: dict[str, [B, 1] f32]; rule_weights: list[float]."""
    # glue: stack dict values along axis 0 -> [P, B]  (B on the lane axis)
    scores_pb = jnp.concatenate(
        [v.astype(jnp.float32).reshape(1, -1) for v in principle_scores.values()],
        axis=0)
    P, B = scores_pb.shape

    # glue: normalize static rule weights -> [P, 1]
    static_w = jnp.asarray(rule_weights, dtype=jnp.float32)
    static_w = (static_w / static_w.sum()).reshape(P, 1)

    w1, b1, w2, b2, wf, bf = (params["w1"], params["b1"], params["w2"],
                              params["b2"], params["wf"], params["bf"])
    H2 = w1.shape[0]

    # B-tile: multiple of 128 lanes, pad B up so the grid divides evenly.
    LANE = 128
    TB = -(-max(int(tile_b), 1) // LANE) * LANE
    TB = min(TB, -(-B // LANE) * LANE)
    B_pad = -(-B // TB) * TB
    if B_pad != B:
        scores_pb = jnp.pad(scores_pb, ((0, 0), (0, B_pad - B)))

    grid = (B_pad // TB,)
    const = lambda shape: pl.BlockSpec(shape, lambda i: (0, 0))

    out = pl.pallas_call(
        _constitution_kernel,
        out_shape=jax.ShapeDtypeStruct((1, B_pad), jnp.float32),
        grid=grid,
        in_specs=[
            pl.BlockSpec((P, TB), lambda i: (0, i)),           # scores tile [P, TB]
            const((H2, P)),                                    # W1  (Linear(P,H2).weight)
            const((H2, 1)),                                    # b1
            const((P, H2)),                                    # W2  (Linear(H2,P).weight)
            const((P, 1)),                                     # b2
            const((P, 1)),                                     # static weights (normalized)
            const((P, 1)),                                     # Wf  (Linear(P,1).weight.T)
            pl.BlockSpec(memory_space=pltpu.MemorySpace.SMEM), # bf scalar in SMEM
        ],
        out_specs=pl.BlockSpec((1, TB), lambda i: (0, i)),     # lane-dense output
        compiler_params=pltpu.CompilerParams(
            dimension_semantics=("parallel",)),
    )(scores_pb, w1, b1, w2, b2, static_w, wf, bf)

    return out[0, :B].reshape(B, 1)


def init_params(key, num_principles, hidden_size):
    """Deterministic synthetic init matching the nn.Linear weight shapes
    (native [out, in] layout, biases kept as column vectors for the kernel)."""
    h2 = hidden_size // 2
    ks = jax.random.split(key, 6)
    s = 0.1
    return {
        "w1": s * jax.random.normal(ks[0], (h2, num_principles), jnp.float32),
        "b1": s * jax.random.normal(ks[1], (h2, 1), jnp.float32),
        "w2": s * jax.random.normal(ks[2], (num_principles, h2), jnp.float32),
        "b2": s * jax.random.normal(ks[3], (num_principles, 1), jnp.float32),
        "wf": s * jax.random.normal(ks[4], (num_principles, 1), jnp.float32),
        "bf": s * jax.random.normal(ks[5], (1, 1), jnp.float32),
    }


if __name__ == "__main__":
    num_principles = 8
    hidden_size = 32
    batch = 512          # 4 lane-dense tiles of 128 -> exercises the pipelined grid

    key = jax.random.PRNGKey(0)
    pkey, skey = jax.random.split(key)
    params = init_params(pkey, num_principles, hidden_size)

    # dict of per-principle scores, each [B, 1]
    score_keys = jax.random.split(skey, num_principles)
    principle_scores = {
        f"principle_{i}": jax.random.uniform(score_keys[i], (batch, 1), jnp.float32)
        for i in range(num_principles)
    }
    rule_weights = [float(i + 1) for i in range(num_principles)]

    reward = constitution_aggregator(principle_scores, rule_weights, params,
                                     tile_b=128)
    jax.block_until_ready(reward)

    # pure-JAX reference (batch-major, matching the PyTorch module)
    scores = jnp.concatenate(list(principle_scores.values()), axis=-1)   # [B, P]
    h = jnp.maximum(scores @ params["w1"].T + params["b1"].T, 0.0)
    dyn = jax.nn.softmax(h @ params["w2"].T + params["b2"].T, axis=-1)
    sw = jnp.asarray(rule_weights, jnp.float32)
    sw = sw / sw.sum()
    ref = (scores * (0.7 * dyn + 0.3 * sw[None, :])) @ params["wf"] \
        + params["bf"][0, 0]

    assert reward.shape == (batch, 1)
    # tolerance relaxed for pl.reciprocal(approx=True) (~2e-4 relative on softmax)
    assert jnp.allclose(reward, ref, atol=2e-3, rtol=2e-3), \
        float(jnp.max(jnp.abs(reward - ref)))

    print("KERNEL_OK")
</pallas_src>

<mosaic_0001>
module attributes {stable_mosaic.version = 11 : i64} {
  func.func @_constitution_kernel(%arg0: i32, %arg1: memref<8x128xf32, #tpu.memory_space<vmem>>, %arg2: memref<16x8xf32, #tpu.memory_space<vmem>>, %arg3: memref<16x1xf32, #tpu.memory_space<vmem>>, %arg4: memref<8x16xf32, #tpu.memory_space<vmem>>, %arg5: memref<8x1xf32, #tpu.memory_space<vmem>>, %arg6: memref<8x1xf32, #tpu.memory_space<vmem>>, %arg7: memref<8x1xf32, #tpu.memory_space<vmem>>, %arg8: memref<1x1xf32, #tpu.memory_space<smem>>, %arg9: memref<1x128xf32, #tpu.memory_space<vmem>>) attributes {dimension_semantics = [#tpu.dimension_semantics<parallel>], iteration_bounds = array<i64: 4>, scalar_prefetch = 0 : i64, scratch_operands = 0 : i64, tpu.core_type = #tpu.core_type<tc>, window_params = [{transform_indices = @transform_0, window_bounds = array<i64: 8, 128>}, {pipeline_mode = #tpu.pipeline_mode<synchronous>, transform_indices = @transform_1, window_bounds = array<i64: 16, 8>}, {pipeline_mode = #tpu.pipeline_mode<synchronous>, transform_indices = @transform_2, window_bounds = array<i64: 16, 1>}, {pipeline_mode = #tpu.pipeline_mode<synchronous>, transform_indices = @transform_3, window_bounds = array<i64: 8, 16>}, {pipeline_mode = #tpu.pipeline_mode<synchronous>, transform_indices = @transform_4, window_bounds = array<i64: 8, 1>}, {pipeline_mode = #tpu.pipeline_mode<synchronous>, transform_indices = @transform_5, window_bounds = array<i64: 8, 1>}, {pipeline_mode = #tpu.pipeline_mode<synchronous>, transform_indices = @transform_6, window_bounds = array<i64: 8, 1>}, {transform_indices = @transform_7, window_bounds = array<i64: 1, 1>}, {transform_indices = @transform_8, window_bounds = array<i64: 1, 128>}]} {
    %c0 = arith.constant 0 : index
    %c0_0 = arith.constant 0 : index
    %0 = vector.load %arg1[%c0, %c0_0] : memref<8x128xf32, #tpu.memory_space<vmem>>, vector<8x128xf32>
    %c0_1 = arith.constant 0 : index
    %c0_2 = arith.constant 0 : index
    %1 = vector.load %arg2[%c0_1, %c0_2] : memref<16x8xf32, #tpu.memory_space<vmem>>, vector<16x8xf32>
    %cst = arith.constant dense<0.000000e+00> : vector<16x128xf32>
    %2 = tpu.matmul %1, %0, %cst {dimension_numbers = #tpu.dot_dimension_numbers<[1], [0], [0], [1], [0, 0, 1, 1], [], []>} : vector<16x8xf32>, vector<8x128xf32>, vector<16x128xf32> -> vector<16x128xf32>
    %c0_3 = arith.constant 0 : index
    %c0_4 = arith.constant 0 : index
    %3 = vector.load %arg3[%c0_3, %c0_4] : memref<16x1xf32, #tpu.memory_space<vmem>>, vector<16x1xf32>
    %4 = vector.broadcast %3 : vector<16x1xf32> to vector<16x128xf32>
    %5 = arith.addf %2, %4 : vector<16x128xf32>
    %cst_5 = arith.constant 0.000000e+00 : f32
    %6 = vector.broadcast %cst_5 : f32 to vector<16x128xf32>
    %7 = arith.maximumf %5, %6 : vector<16x128xf32>
    %c0_6 = arith.constant 0 : index
    %c0_7 = arith.constant 0 : index
    %8 = vector.load %arg4[%c0_6, %c0_7] : memref<8x16xf32, #tpu.memory_space<vmem>>, vector<8x16xf32>
    %cst_8 = arith.constant dense<0.000000e+00> : vector<8x128xf32>
    %9 = tpu.matmul %8, %7, %cst_8 {dimension_numbers = #tpu.dot_dimension_numbers<[1], [0], [0], [1], [0, 0, 1, 1], [], []>} : vector<8x16xf32>, vector<16x128xf32>, vector<8x128xf32> -> vector<8x128xf32>
    %c0_9 = arith.constant 0 : index
    %c0_10 = arith.constant 0 : index
    %10 = vector.load %arg5[%c0_9, %c0_10] : memref<8x1xf32, #tpu.memory_space<vmem>>, vector<8x1xf32>
    %11 = vector.broadcast %10 : vector<8x1xf32> to vector<8x128xf32>
    %12 = arith.addf %9, %11 : vector<8x128xf32>
    %cst_11 = arith.constant dense<0xFF800000> : vector<128xf32>
    %13 = vector.multi_reduction <maximumf>, %12, %cst_11 [0] : vector<8x128xf32> to vector<128xf32>
    %14 = vector.shape_cast %13 : vector<128xf32> to vector<1x128xf32>
    %15 = vector.broadcast %14 : vector<1x128xf32> to vector<8x128xf32>
    %16 = arith.subf %12, %15 : vector<8x128xf32>
    %17 = math.exp %16 : vector<8x128xf32>
    %cst_12 = arith.constant dense<0.000000e+00> : vector<128xf32>
    %18 = vector.multi_reduction <add>, %17, %cst_12 [0] : vector<8x128xf32> to vector<128xf32>
    %19 = vector.shape_cast %18 : vector<128xf32> to vector<1x128xf32>
    %20 = tpu.reciprocal %19 {approx = true} : vector<1x128xf32> -> vector<1x128xf32>
    %21 = vector.broadcast %20 : vector<1x128xf32> to vector<8x128xf32>
    %22 = arith.mulf %17, %21 : vector<8x128xf32>
    %cst_13 = arith.constant 0.699999988 : f32
    %23 = vector.broadcast %cst_13 : f32 to vector<8x128xf32>
    %24 = arith.mulf %23, %22 : vector<8x128xf32>
    %c0_14 = arith.constant 0 : index
    %c0_15 = arith.constant 0 : index
    %25 = vector.load %arg6[%c0_14, %c0_15] : memref<8x1xf32, #tpu.memory_space<vmem>>, vector<8x1xf32>
    %cst_16 = arith.constant 3.000000e-01 : f32
    %26 = vector.broadcast %cst_16 : f32 to vector<8x1xf32>
    %27 = arith.mulf %26, %25 : vector<8x1xf32>
    %28 = vector.broadcast %27 : vector<8x1xf32> to vector<8x128xf32>
    %29 = arith.addf %24, %28 : vector<8x128xf32>
    %30 = arith.mulf %0, %29 : vector<8x128xf32>
    %c0_17 = arith.constant 0 : index
    %c0_18 = arith.constant 0 : index
    %31 = vector.load %arg7[%c0_17, %c0_18] : memref<8x1xf32, #tpu.memory_space<vmem>>, vector<8x1xf32>
    %32 = vector.broadcast %31 : vector<8x1xf32> to vector<8x128xf32>
    %33 = arith.mulf %30, %32 : vector<8x128xf32>
    %cst_19 = arith.constant dense<0.000000e+00> : vector<128xf32>
    %34 = vector.multi_reduction <add>, %33, %cst_19 [0] : vector<8x128xf32> to vector<128xf32>
    %35 = vector.shape_cast %34 : vector<128xf32> to vector<1x128xf32>
    %c0_20 = arith.constant 0 : index
    %c0_21 = arith.constant 0 : index
    %36 = memref.load %arg8[%c0_20, %c0_21] : memref<1x1xf32, #tpu.memory_space<smem>>
    %37 = vector.broadcast %36 : f32 to vector<1x128xf32>
    %38 = arith.addf %35, %37 : vector<1x128xf32>
    %c0_22 = arith.constant 0 : index
    %c0_23 = arith.constant 0 : index
    %39 = vector.load %arg9[%c0_22, %c0_23] : memref<1x128xf32, #tpu.memory_space<vmem>>, vector<1x128xf32>
    tpu.vector_store %arg9[%c0_22, %c0_23], %38 {strides = array<i32>} : memref<1x128xf32, #tpu.memory_space<vmem>>, vector<1x128xf32>,
    return
  }
  func.func @transform_0(%arg0: i32) -> (i32, i32) {
    %c0_i32 = arith.constant 0 : i32
    %c0_i32_0 = arith.constant 0 : i32
    return %c0_i32, %arg0 : i32, i32
  }
  func.func @transform_1(%arg0: i32) -> (i32, i32) {
    %c0_i32 = arith.constant 0 : i32
    %c0_i32_0 = arith.constant 0 : i32
    %c0_i32_1 = arith.constant 0 : i32
    return %c0_i32, %c0_i32_0 : i32, i32
  }
  func.func @transform_2(%arg0: i32) -> (i32, i32) {
    %c0_i32 = arith.constant 0 : i32
    %c0_i32_0 = arith.constant 0 : i32
    %c0_i32_1 = arith.constant 0 : i32
    return %c0_i32, %c0_i32_0 : i32, i32
  }
  func.func @transform_3(%arg0: i32) -> (i32, i32) {
    %c0_i32 = arith.constant 0 : i32
    %c0_i32_0 = arith.constant 0 : i32
    %c0_i32_1 = arith.constant 0 : i32
    return %c0_i32, %c0_i32_0 : i32, i32
  }
  func.func @transform_4(%arg0: i32) -> (i32, i32) {
    %c0_i32 = arith.constant 0 : i32
    %c0_i32_0 = arith.constant 0 : i32
    %c0_i32_1 = arith.constant 0 : i32
    return %c0_i32, %c0_i32_0 : i32, i32
  }
  func.func @transform_5(%arg0: i32) -> (i32, i32) {
    %c0_i32 = arith.constant 0 : i32
    %c0_i32_0 = arith.constant 0 : i32
    %c0_i32_1 = arith.constant 0 : i32
    return %c0_i32, %c0_i32_0 : i32, i32
  }
  func.func @transform_6(%arg0: i32) -> (i32, i32) {
    %c0_i32 = arith.constant 0 : i32
    %c0_i32_0 = arith.constant 0 : i32
    %c0_i32_1 = arith.constant 0 : i32
    return %c0_i32, %c0_i32_0 : i32, i32
  }
  func.func @transform_7(%arg0: i32) -> (i32, i32) {
    %c0_i32 = arith.constant 0 : i32
    %c0_i32_0 = arith.constant 0 : i32
    %c0_i32_1 = arith.constant 0 : i32
    return %c0_i32, %c0_i32_0 : i32, i32
  }
  func.func @transform_8(%arg0: i32) -> (i32, i32) {
    %c0_i32 = arith.constant 0 : i32
    %c0_i32_0 = arith.constant 0 : i32
    return %c0_i32, %arg0 : i32, i32
  }
}

</mosaic_0001>

<bundles_post_ra>
// kernel: tpu_custom_call.1
= control target key start
LH: loop header
LB: loop body
LE: loop exit
PB: predicated region body
PF: predicated region fallthrough
CT: control target
= control target key end

     0   :  { %s917_s0 = inlined_call_operand.vmem [shape: f32[8,512], index: 0, kind: input, shape index: {}]   ;;  %s918_s1 = inlined_call_operand.vmem [shape: f32[16,8], index: 1, kind: input, shape index: {}]   ;;  %s919_s2 = inlined_call_operand.vmem [shape: f32[16,1], index: 2, kind: input, shape index: {}]   ;;  %s920_s3 = inlined_call_operand.vmem [shape: f32[8,16], index: 3, kind: input, shape index: {}]   ;;  %s921_s4 = inlined_call_operand.vmem [shape: f32[8,1], index: 4, kind: input, shape index: {}]   ;;  %s922_s5 = inlined_call_operand.vmem [shape: f32[8,1], index: 5, kind: input, shape index: {}]   ;;  %s923_s6 = inlined_call_operand.vmem [shape: f32[8,1], index: 6, kind: input, shape index: {}]   ;;  %s924_s7 = inlined_call_operand.<no memory space> [shape: f32[1,1], index: 7, kind: input, shape index: {}]   ;;  %s925_s8 = inlined_call_operand.hbm [shape: f32[1,512], index: 8, kind: output, shape index: {}]  }
   0x1   :  { %13 = sst [smem:[#allocation2]] %s924_s7 }
   0x2   :  { %14 = vsyncpa [#allocation4], 0 }
   0x3   :  { %16 = vsyncpa [#allocation4 + $0x1], 0  ;;  %s791_s29 = smov 0   ;;  %s793_s30 = smov 0  }
   0x4   :  { %s795_s9 = smov 0   ;;  %s797_s10 = smov 0  }
   0x5 LB: > { %s812_s7 = sadd.s32 4294967295, %s736_s10   ;;  %s593_s11 = sadd.s32 4294967294, %s736_s10   ;;  %s736_s10 = sphi %s797_s10, %s931_s10   ;;  %s732_s9 = sphi %s795_s9, %s930_s9   ;;  %s728_s30 = sphi %s793_s30, %s929_s30   ;;  %s724_s29 = sphi %s791_s29, %s928_s29  }
   0x6   : > { %s816_s12 = sadd.s32 1, %s736_s10   ;;  %s202_s13 = sadd.s32 1, %s732_s9 }
   0x7   : > { %s199_s14 = ssub.s32 %s736_s10, %s816_s12  ;;  %p212_p0 = scmp.ne.s32.totalorder %s732_s9, %s728_s30 }
   0x8   : > { %p200_p1 = scmp.eq.s32.totalorder %s199_s14, 0  ;;  %p213_p2 = scmp.eq.s32.totalorder %s812_s7, 3 }
   0x9   : > { %p218_p3 = scmp.ne.s32.totalorder %s728_s30, %s724_s29  ;;  %p219_p4 = scmp.eq.s32.totalorder %s593_s11, 3 }
   0xa   : > { %s827_s15 = scalar_select %p200_p1, %s732_s9, %s202_s13  }
   0xb   : > { %p829_p5 = por %p213_p2, %p212_p0  ;;  %p833_p6 = por %p219_p4, %p218_p3 }
   0xc   : > { %p596_p7 = scmp.ge.s32.totalorder %s736_s10, 1  ;;  %p265_p8 = scmp.lt.s32.totalorder %s736_s10, 5 }
   0xe   : > { %p266_p9 = pnand %p596_p7, %p265_p8 }
   0xf   : > { %p297_p10 = scmp.lt.s32.totalorder (!%p266_p9), %s812_s7, 3  ;;  %v302_v0 = vld [vmem:[%s918_s1] sm:$0xff] (!%p266_p9)  ;;  %vm316_vm0 = vcmask (!%p266_p9), 64512   ;;  %v738_v2 = vmov (!%p266_p9), 0   ;;  %v305_v3 = vld [vmem:[%s919_s2 + $0x8] sm:$0xff] (!%p266_p9)  ;;  %v739_v7 = vmov (!%p266_p9), 0.0|0.0  }
  0x10   : > { %269 = sbr.rel (%p266_p9) target bundleno = 554 (0x22a), region = 52  ;;  %v304_v1 = vld [vmem:[%s919_s2] sm:$0xff] (!%p266_p9)  ;;  %612 = vmatprep.mubr.msk.f32.mxu0 (!%p266_p9), %vm316_vm0, %v302_v0  ;;  %668 = vset.pattern.permute.xlu0 (!%p266_p9), %v738_v2  ;;  %v303_v5 = vld [vmem:[%s918_s1 + $0x8] sm:$0xff] (!%p266_p9)  ;;  %vm740_vm1 = vmmov (!%p266_p9), 0   ;;  %v741_v8 = vmov (!%p266_p9), 0.0   ;;  %vm407_vm2 = vcmask (!%p266_p9), 130048  }
  0x11   : > { %308 = vperm.xlu0 (!%p266_p9), %668, %v304_v1   ;;  %669 = vset.pattern.permute.xlu1 (!%p266_p9), %v738_v2  ;;  %v508_v6 = vld [vmem:[%s923_s6] sm:$0xff] (!%p266_p9)  ;;  %s295_s26 = sand.u32 (!%p266_p9), 1, %s728_s30   ;;  %s601_s27 = sshll.u32 (!%p266_p9), %s812_s7, 4 }
  0x12   : > { %622 = vmatprep.subr.bf16.mxu1 (!%p266_p9), %v739_v7  ;;  %619 = vmatprep.mubr.msk.f32.mxu1 (!%p266_p9), %vm740_vm1, %v741_v8  ;;  %v401_v9 = vld [vmem:[%s921_s4] sm:$0xff] (!%p266_p9)  ;;  %s875_s18 = scalar_lea.hbm (!%p266_p9), %s925_s8, %s601_s27  ;;  %s526_s19 = scalar_lea.sflag (!%p266_p9), [#allocation4], %s295_s26 }
  0x13   : > { %v499_v10 = vld [vmem:[%s922_s5] sm:$0xff] (!%p266_p9)  ;;  %404 = vperm.xlu1 (!%p266_p9), %669, %v401_v9  }
  0x14   : > { %v500_v11 = vmul.f32 (!%p266_p9), 0.3, %v499_v10  ;;  %v400_v21 = vld [vmem:[%s920_s3] sm:$0xff] (!%p266_p9) }
  0x15   : > { %313 = vperm.xlu0 (!%p266_p9), %668, %v305_v3  }
  0x17   : > { %s298_s22 = scalar_select %p297_p10, %s812_s7, 3  ;;  %503 = vperm.xlu1 %669, %v500_v11  }
  0x18   : > { %s742_s7 = smov [#allocation3]  }
  0x19   : > { %s597_s25 = sshll.u32 %s298_s22, 3  ;;  %511 = vperm.xlu0 %668, %v508_v6   ;;  %s678_s21 = sshll.u32 %s742_s7, 4  ;;  %s679_s21 = int_to_ptr.vmem [resolvable:$false] %s678_s21 }
  0x1a   : > { %s300_s28 = scalar_lea.vmem %s917_s0, %s597_s25  ;;  %s521_s25 = sld [smem:[#allocation2]] }
  0x1b   : > { %v301_v4 = vld [vmem:[%s300_s28] sm:$0xff]  ;;  %s296_s28 = scalar_lea.vmem [#allocation3], %s295_s26  ;;  %s680_s22 = scalar_lea.vmem %s679_s21, 32 }
  0x1c   : > { %610 = vmatprep.subr.mxu0 %v301_v4  ;;  %s538_s11 = sshll.u32 %s296_s28, 4  ;;  %s877_s11 = int_to_ptr.vmem [resolvable:$true] %s538_s11 }
  0x1d   : > { %611 = vmatpush3.msra.mxu0 %v301_v4  ;;  %s674_s20 = scalar_lea.vmem %s877_s11, 16  ;;  %p681_p0 = scmp.lt.s32.totalorder %s877_s11, %s679_s21 }
  0x1e   : > { %613 = vmatmul.mubr.msk.f32.vlgmr.msra.gmra.mrb[0].mxu0 %vm316_vm0, %v303_v5  ;;  %p675_p11 = scmp.ne.s32.totalorder %s877_s11, %s674_s20  ;;  %p682_p1 = scmp.lt.s32.totalorder %s680_s22, %s674_s20 }
  0x20   : > { %v522_v54 = vstv %s521_s25  ;;  %p676_p12 = pnand %p675_p11, %p829_p5  ;;  %p683_p2 = por %p682_p1, %p681_p0 }
  0x22   : > { %p677_p13 = pneg %p676_p12 }
  0x24   : > { %p684_p3 = pnand %p683_p2, %p677_p13 }
  0x90   : > { %v309_v12 = vpop.permute.xlu0 %308 }
  0x92   : > { %v405_v22 = vpop.permute.xlu1 %404 }
  0x94   : > { %v314_v13 = vpop.permute.xlu0 %313 }
  0x96   : > { %v504_v44 = vpop.permute.xlu1 %503 }
  0x98   : > { %v512_v47 = vpop.permute.xlu0 %511 }
  0xf1   : > { %v614_v14 = vpop.f32.mrb[0].mxu0 }
  0xf2   : > { %v395_v15 = vadd.f32 %v614_v14, %v314_v13  ;;  %v389_v16 = vpop.f32.mrb[1].mxu0 }
  0xf3   : > { %v390_v17 = vadd.f32 %v389_v16, %v309_v12 }
  0xf4   : > { %v399_v18 = vmax.f32 %v395_v15, 0.0 }
  0xf5   : > { %v398_v19 = vmax.f32 %v390_v17, 0.0 }
  0xf7   : > { %v623_v20 = vpack.c.bf16 %v399_v18, %v398_v19 }
  0xf9   : > { %624 = vmatpush3.bf16.msra.mxu1 %v623_v20 }
  0xfc   : > { %620 = vmatmul.mubr.msk.f32.vlgmr.msra.gmra.mrb[0].mxu1 %vm407_vm2, %v400_v21 }
 0x1cf   : > { %v477_v23 = vpop.f32.mrb[0].mxu1 }
 0x1d0   : > { %v478_v24 = vadd.f32 %v477_v23, %v405_v22  ;;  %v621_v25 = vpop.f32.mrb[1].mxu1 }
 0x1d2   : > { %v481_v26 = vrot.slane %v478_v24, 4 }
 0x1d4   : > { %v482_v27 = vmax.f32 %v478_v24, %v481_v26 }
 0x1d6   : > { %v483_v28 = vrot.slane %v482_v27, 2 }
 0x1d8   : > { %v484_v29 = vmax.f32 %v482_v27, %v483_v28 }
 0x1da   : > { %v485_v30 = vrot.slane %v484_v29, 1 }
 0x1dc   : > { %v486_v31 = vmax.f32 %v484_v29, %v485_v30 }
 0x1de   : > { %v487_v32 = vsub.f32 %v478_v24, %v486_v31 }
 0x1e0   : > { %v488_v33 = vmul.f32 1.442695, %v487_v32 }
 0x1e2   : > { %670 = vpow2.f32 %v488_v33 }
 0x1ec   : > { %v671_v34 = vpop.eup %670 }
 0x1ed   : > { %v490_v35 = vrot.slane %v671_v34, 4 }
 0x1ef   : > { %v491_v36 = vadd.f32 %v671_v34, %v490_v35 }
 0x1f1   : > { %v492_v37 = vrot.slane %v491_v36, 2 }
 0x1f3   : > { %v493_v38 = vadd.f32 %v492_v37, %v491_v36 }
 0x1f5   : > { %v494_v39 = vrot.slane %v493_v38, 1 }
 0x1f7   : > { %v495_v40 = vadd.f32 %v494_v39, %v493_v38 }
 0x1f9   : > { %672 = vrcp.f32 %v495_v40 }
 0x203   : > { %v673_v41 = vpop.eup %672 }
 0x204   : > { %v497_v42 = vmul.f32 %v673_v41, %v671_v34 }
 0x206   : > { %v498_v43 = vmul.f32 0.7, %v497_v42 }
 0x208   : > { %v506_v45 = vadd.f32 %v504_v44, %v498_v43 }
 0x20a   : > { %v507_v46 = vmul.f32 %v506_v45, %v301_v4 }
 0x20c   : > { %v514_v48 = vmul.f32 %v512_v47, %v507_v46 }
 0x20e   : > { %v515_v49 = vrot.slane %v514_v48, 4 }
 0x210   : > { %v516_v50 = vadd.f32 %v515_v49, %v514_v48 }
 0x212   : > { %v517_v51 = vrot.slane %v516_v50, 2 }
 0x214   : > { %v518_v52 = vadd.f32 %v517_v51, %v516_v50 }
 0x216   : > { %v519_v53 = vrot.slane %v518_v52, 1 }
 0x218   : > { %v520_v55 = vadd.f32 %v519_v53, %v518_v52 }
 0x21a   : > { %v523_v56 = vadd.f32 %v522_v54, %v520_v55 }
 0x21c   : > { %524 = vst [vmem:[%s296_s28] sm:$0x1] %v523_v56 }
 0x21d   : > { %687 = shalt.err (!%p684_p3)
}
 0x21e   : > { %s688_s23 = scalar_lea.hbm %s875_s18, 16  ;;  %s692_s26 = scalar_lea.hbm %s925_s8, 64 }
 0x21f   : > { %p689_p4 = scmp.ne.s32.totalorder %s875_s18, %s688_s23  ;;  %p693_p9 = scmp.lt.u32.totalorder %s875_s18, %s925_s8 }
 0x220   : > { %p694_p10 = scmp.lt.u32.totalorder %s692_s26, %s688_s23  ;;  %p696_p12 = scmp.lt.u32.totalorder %s688_s23, %s875_s18 }
 0x221   : > { %p690_p7 = pnand %p689_p4, %p829_p5 }
 0x222   : > { %p695_p11 = por %p694_p10, %p693_p9 }
 0x223   : > { %p691_p8 = pneg %p690_p7 }
 0x224   : > { %p697_p13 = por %p696_p12, %p695_p11 }
 0x226   : > { %p698_p0 = pnand %p697_p13, %p691_p8 }
 0x228   : > { %701 = shalt.err (!%p698_p0)
}
 0x229   : > { %625 = dma.vmem_to_hbm [thread:$0]  (%p829_p5), %s877_s11, 16, %s875_s18, %s526_s19  }
 0x22a PF: > { %p631_p1 = scmp.ge.s32.totalorder %s736_s10, 2  ;;  %s550_s13 = sand.u32 1, %s724_s29  }
 0x22b   : > { %s551_s14 = scalar_lea.sflag [#allocation4], %s550_s13 }
 0x22c   : > { %p628_p2 = pnand %p631_p1, %p833_p6 }
 0x22e   : > { %719 = dma.done.wait (!%p628_p2), %s551_s14, 16  }
 0x22f   : > { %721 = vsyncadd (!%p628_p2), %s551_s14, 4294967280  ;;  %p19_p3 = scmp.ge.s32.totalorder %s816_s12, 6   ;;  %s928_s29 = smov %s728_s30 }
 0x230   : > { %s929_s30 = smov %s732_s9  ;;  %s930_s9 = smov %s827_s15 }
 0x231   : > { %s931_s10 = smov %s816_s12  ;;  %21 = sbr.rel (!%p19_p3) target bundleno = 5 (0x5), region = 87 }
 0x238   :  { %555 = vsyncpa [#allocation4], 1 }
 0x239   :  { %557 = vsyncpa [#allocation4 + $0x1], 1 }

</bundles_post_ra>
